<compile_context>
chip_gen: v6e
topology: v6e:2x2x1
jax: 0.10.0
libtpu: 0.0.40
codegen_flags: <defaults>
</compile_context>

<pallas_src>
import functools

import jax
import jax.numpy as jnp
from jax.experimental import pallas as pl
from jax.experimental.pallas import tpu as pltpu


def _round_up(x, m):
    return (x + m - 1) // m * m


def _cdiv(a, b):
    return (a + b - 1) // b


def ex2vec_kernel(params_ref,  # SMEM (8,) f32: [global_lamb, alpha, beta, gamma, cutoff, 0,0,0]
                  u_ref,       # VMEM (D, TB) user embeddings (batch on lanes)
                  i_ref,       # VMEM (D, TB) item embeddings (batch on lanes)
                  r_ref,       # VMEM (T, TB) listening intervals (batch on lanes)
                  tail_ref,    # VMEM (8, TB) rows: 0=u_bias, 1=i_bias, 2=user_lamb
                  out_ref,     # VMEM (2, TB) rows: 0=interest, 1=distance
                  *, use_tanh):
    global_lamb = params_ref[0]
    alpha = params_ref[1]
    beta = params_ref[2]
    gamma = params_ref[3]
    cutoff = params_ref[4]

    u_bias = tail_ref[0:1, :]                                     # (1, TB)
    i_bias = tail_ref[1:2, :]                                     # (1, TB)
    user_lamb = tail_ref[2:3, :]                                  # (1, TB)

    # base_distance = sum over latent dim of sqrt(diff^2) == sum(|diff|).
    diff = i_ref[...] - u_ref[...]                                # (D, TB)
    base_distance = jnp.sum(jnp.abs(diff), axis=0, keepdims=True)  # (1, TB)

    # Memory-decay term over listening intervals.
    r = r_ref[...]                                                # (T, TB)
    mask = (r > 0).astype(jnp.float32)
    cutoff_c = jnp.clip(cutoff, 0.1, 100.0)
    delta_t = r * mask + cutoff_c
    pow_values = jax.lax.rsqrt(delta_t) * mask                    # delta_t**-0.5, masked
    base_level = jnp.sum(pow_values, axis=0, keepdims=True)       # (1, TB)

    lamb = jnp.clip(global_lamb, 0.01, 10.0) + jnp.clip(user_lamb, 0.1, 10.0)
    base_activation = base_level * lamb
    activation = jnp.minimum(base_activation, base_distance)
    distance = base_distance - activation                         # (1, TB)

    I = alpha * distance + beta * distance * distance + gamma + u_bias + i_bias
    interest = jnp.tanh(I) if use_tanh else jax.nn.sigmoid(I)     # (1, TB)

    # Direct lane-dense row stores (no concat temporary).
    out_ref[0:1, :] = interest
    out_ref[1:2, :] = distance


def ex2vec_forward(params_vec, user_emb, item_emb, u_bias, i_bias, user_lamb,
                   r_interval, *, tile_b=4096, use_tanh=False):
    """params_vec: (>=5,) f32 [global_lamb, alpha, beta, gamma, cutoff];
    user_emb/item_emb: (B, D); u_bias/i_bias/user_lamb: (B, 1);
    r_interval: (B, T).  Returns (interest (B,), distance (B,))."""
    B, D = user_emb.shape
    T = r_interval.shape[1]
    f32 = jnp.float32

    # Pad batch only to the 128-lane boundary (not to the tile size).
    B_pad = _round_up(B, 128)
    pad = B_pad - B

    tile_cap = max(128, (int(tile_b) // 128) * 128)
    TB = min(tile_cap, B_pad)
    # Keep >= 2 grid steps when the batch allows it so the "parallel" grid
    # axis can be sharded across v7x's two TensorCores.
    if B_pad >= 256 and _cdiv(B_pad, TB) < 2:
        TB = _round_up(_cdiv(B_pad, 2), 128)
    grid = _cdiv(B_pad, TB)

    # Lane-dense inputs: batch on the 128-lane axis, padded with zeros to
    # B_pad lanes (padded lanes stay finite: mask=0, delta_t=cutoff>0).
    user_t = jnp.pad(user_emb.astype(f32), ((0, pad), (0, 0))).T      # (D, B_pad)
    item_t = jnp.pad(item_emb.astype(f32), ((0, pad), (0, 0))).T      # (D, B_pad)
    r_t = jnp.pad(r_interval.astype(f32), ((0, pad), (0, 0))).T       # (T, B_pad)
    tail = jnp.concatenate([u_bias, i_bias, user_lamb], axis=1).astype(f32)  # (B, 3)
    tail = jnp.pad(tail, ((0, pad), (0, 8 - tail.shape[1]))).T        # (8, B_pad)

    params8 = jnp.zeros((8,), f32).at[:5].set(params_vec[:5].astype(f32))

    kernel = functools.partial(ex2vec_kernel, use_tanh=use_tanh)

    out = pl.pallas_call(
        kernel,
        out_shape=jax.ShapeDtypeStruct((2, B_pad), f32),
        grid=(grid,),
        in_specs=[
            pl.BlockSpec(memory_space=pltpu.MemorySpace.SMEM),   # params (whole)
            pl.BlockSpec((D, TB), lambda i: (0, i)),             # user embeddings
            pl.BlockSpec((D, TB), lambda i: (0, i)),             # item embeddings
            pl.BlockSpec((T, TB), lambda i: (0, i)),             # intervals
            pl.BlockSpec((8, TB), lambda i: (0, i)),             # bias/lambda tail
        ],
        out_specs=pl.BlockSpec((2, TB), lambda i: (0, i)),
        compiler_params=pltpu.CompilerParams(
            dimension_semantics=("parallel",)),
    )(params8, user_t, item_t, r_t, tail)

    return out[0, :B], out[1, :B]


def ex2vec_apply(weights, user_indices, item_indices, r_interval,
                 item_embds=None, use_tanh=False, tile_b=4096):
    """Mirrors Ex2Vec.forward: embedding gathers are plain-JAX glue."""
    item_table = weights["embedding_item"] if item_embds is None else item_embds
    user_emb = weights["embedding_user"][user_indices]
    item_emb = item_table[item_indices]
    u_bias = weights["user_bias"][user_indices]
    i_bias = weights["item_bias"][item_indices]
    user_lamb = weights["user_lamb"][user_indices]
    params_vec = jnp.stack([weights["global_lamb"], weights["alpha"],
                            weights["beta"], weights["gamma"],
                            weights["cutoff"]])
    return ex2vec_forward(params_vec, user_emb, item_emb, u_bias, i_bias,
                          user_lamb, r_interval, tile_b=tile_b,
                          use_tanh=use_tanh)


def reference_forward(params_vec, user_emb, item_emb, u_bias, i_bias, user_lamb,
                      r_interval, use_tanh=False):
    # Pure-JAX reference mirroring the PyTorch semantics.
    global_lamb, alpha, beta, gamma, cutoff = [params_vec[i] for i in range(5)]
    diff = item_emb - user_emb
    base_distance = jnp.sqrt(diff ** 2).sum(axis=1)
    mask = (r_interval > 0).astype(jnp.float32)
    delta_t = r_interval * mask + jnp.clip(cutoff, 0.1, 100.0)
    pow_values = delta_t ** (-0.5) * mask
    base_level = jnp.sum(pow_values, axis=-1)
    lamb = jnp.clip(global_lamb, 0.01, 10.0) + jnp.clip(user_lamb[:, 0], 0.1, 10.0)
    base_activation = base_level * lamb
    activation = jnp.minimum(base_activation, base_distance)
    distance = base_distance - activation
    I = alpha * distance + beta * distance ** 2 + gamma + u_bias[:, 0] + i_bias[:, 0]
    interest = jnp.tanh(I) if use_tanh else jax.nn.sigmoid(I)
    return interest, distance


if __name__ == "__main__":
    key = jax.random.PRNGKey(0)
    n_users, n_items, latent_d = 10, 20, 32

    ks = jax.random.split(key, 8)
    # Deterministic synthetic "checkpoint".
    weights = {
        "embedding_user": jax.random.normal(ks[0], (n_users, latent_d), jnp.float32) * 0.1,
        "embedding_item": jax.random.normal(ks[1], (n_items, latent_d), jnp.float32) * 0.1,
        "user_bias": jax.random.normal(ks[2], (n_users, 1), jnp.float32) * 0.01,
        "item_bias": jax.random.normal(ks[3], (n_items, 1), jnp.float32) * 0.01,
        "user_lamb": jax.random.normal(ks[4], (n_users, 1), jnp.float32) * 0.01 + 1.0,
        "global_lamb": jnp.float32(1.0),
        "alpha": jnp.float32(1.0),
        "beta": jnp.float32(-0.065),
        "gamma": jnp.float32(0.5),
        "cutoff": jnp.float32(3.0),
    }
    params_vec = jnp.stack([weights["global_lamb"], weights["alpha"],
                            weights["beta"], weights["gamma"],
                            weights["cutoff"]])

    def run_case(case_key, B, T, use_tanh, tile_b):
        k1, k2, k3 = jax.random.split(case_key, 3)
        user_indices = jax.random.randint(k1, (B,), 0, n_users)
        item_indices = jax.random.randint(k2, (B,), 0, n_items)
        # Mix of positive and non-positive intervals to exercise the mask.
        r_interval = jax.random.uniform(k3, (B, T), jnp.float32,
                                        minval=-2.0, maxval=10.0)

        interest, distance = ex2vec_apply(weights, user_indices, item_indices,
                                          r_interval, use_tanh=use_tanh,
                                          tile_b=tile_b)
        jax.block_until_ready((interest, distance))

        ref_i, ref_d = reference_forward(
            params_vec,
            weights["embedding_user"][user_indices],
            weights["embedding_item"][item_indices],
            weights["user_bias"][user_indices],
            weights["item_bias"][item_indices],
            weights["user_lamb"][user_indices],
            r_interval, use_tanh=use_tanh)
        assert jnp.allclose(interest, ref_i, atol=1e-5, rtol=1e-5)
        assert jnp.allclose(distance, ref_d, atol=1e-5, rtol=1e-5)

    # Small batch: single grid step, sigmoid head.
    run_case(ks[5], B=8, T=8, use_tanh=False, tile_b=4096)
    # Larger ragged batch (B_pad=384, TB=128 -> 3 parallel grid steps), tanh head.
    run_case(ks[6], B=300, T=8, use_tanh=True, tile_b=128)
    print("KERNEL_OK")
</pallas_src>

<mosaic_0001>
module attributes {stable_mosaic.version = 11 : i64} {
  func.func @ex2vec_kernel(%arg0: i32, %arg1: memref<8xf32, #tpu.memory_space<smem>>, %arg2: memref<32x128xf32, #tpu.memory_space<vmem>>, %arg3: memref<32x128xf32, #tpu.memory_space<vmem>>, %arg4: memref<8x128xf32, #tpu.memory_space<vmem>>, %arg5: memref<8x128xf32, #tpu.memory_space<vmem>>, %arg6: memref<2x128xf32, #tpu.memory_space<vmem>>) attributes {dimension_semantics = [#tpu.dimension_semantics<parallel>], iteration_bounds = array<i64: 1>, scalar_prefetch = 0 : i64, scratch_operands = 0 : i64, tpu.core_type = #tpu.core_type<tc>, window_params = [{transform_indices = @transform_0, window_bounds = array<i64: 8>}, {transform_indices = @transform_1, window_bounds = array<i64: 32, 128>}, {transform_indices = @transform_2, window_bounds = array<i64: 32, 128>}, {transform_indices = @transform_3, window_bounds = array<i64: 8, 128>}, {transform_indices = @transform_4, window_bounds = array<i64: 8, 128>}, {transform_indices = @transform_5, window_bounds = array<i64: 2, 128>}]} {
    %c0 = arith.constant 0 : index
    %0 = memref.load %arg1[%c0] : memref<8xf32, #tpu.memory_space<smem>>
    %c1 = arith.constant 1 : index
    %1 = memref.load %arg1[%c1] : memref<8xf32, #tpu.memory_space<smem>>
    %c2 = arith.constant 2 : index
    %2 = memref.load %arg1[%c2] : memref<8xf32, #tpu.memory_space<smem>>
    %c3 = arith.constant 3 : index
    %3 = memref.load %arg1[%c3] : memref<8xf32, #tpu.memory_space<smem>>
    %c4 = arith.constant 4 : index
    %4 = memref.load %arg1[%c4] : memref<8xf32, #tpu.memory_space<smem>>
    %c0_0 = arith.constant 0 : index
    %c0_1 = arith.constant 0 : index
    %5 = vector.load %arg5[%c0_0, %c0_1] : memref<8x128xf32, #tpu.memory_space<vmem>>, vector<1x128xf32>
    %c1_2 = arith.constant 1 : index
    %c0_3 = arith.constant 0 : index
    %6 = vector.load %arg5[%c1_2, %c0_3] : memref<8x128xf32, #tpu.memory_space<vmem>>, vector<1x128xf32>
    %c2_4 = arith.constant 2 : index
    %c0_5 = arith.constant 0 : index
    %7 = vector.load %arg5[%c2_4, %c0_5] : memref<8x128xf32, #tpu.memory_space<vmem>>, vector<1x128xf32>
    %c0_6 = arith.constant 0 : index
    %c0_7 = arith.constant 0 : index
    %8 = vector.load %arg3[%c0_6, %c0_7] : memref<32x128xf32, #tpu.memory_space<vmem>>, vector<32x128xf32>
    %c0_8 = arith.constant 0 : index
    %c0_9 = arith.constant 0 : index
    %9 = vector.load %arg2[%c0_8, %c0_9] : memref<32x128xf32, #tpu.memory_space<vmem>>, vector<32x128xf32>
    %10 = arith.subf %8, %9 : vector<32x128xf32>
    %11 = math.absf %10 : vector<32x128xf32>
    %cst = arith.constant dense<0.000000e+00> : vector<128xf32>
    %12 = vector.multi_reduction <add>, %11, %cst [0] : vector<32x128xf32> to vector<128xf32>
    %13 = vector.shape_cast %12 : vector<128xf32> to vector<1x128xf32>
    %c0_10 = arith.constant 0 : index
    %c0_11 = arith.constant 0 : index
    %14 = vector.load %arg4[%c0_10, %c0_11] : memref<8x128xf32, #tpu.memory_space<vmem>>, vector<8x128xf32>
    %cst_12 = arith.constant 0.000000e+00 : f32
    %15 = vector.broadcast %cst_12 : f32 to vector<8x128xf32>
    %16 = arith.cmpf ogt, %14, %15 : vector<8x128xf32>
    %17 = arith.extui %16 : vector<8x128xi1> to vector<8x128xi32>
    %18 = arith.sitofp %17 : vector<8x128xi32> to vector<8x128xf32>
    %cst_13 = arith.constant 1.000000e-01 : f32
    %cst_14 = arith.constant 1.000000e+02 : f32
    %19 = arith.maximumf %cst_13, %4 : f32
    %20 = arith.minimumf %cst_14, %19 : f32
    %21 = arith.mulf %14, %18 : vector<8x128xf32>
    %22 = vector.broadcast %20 : f32 to vector<8x128xf32>
    %23 = arith.addf %21, %22 : vector<8x128xf32>
    %24 = math.rsqrt %23 : vector<8x128xf32>
    %25 = arith.mulf %24, %18 : vector<8x128xf32>
    %cst_15 = arith.constant dense<0.000000e+00> : vector<128xf32>
    %26 = vector.multi_reduction <add>, %25, %cst_15 [0] : vector<8x128xf32> to vector<128xf32>
    %27 = vector.shape_cast %26 : vector<128xf32> to vector<1x128xf32>
    %cst_16 = arith.constant 0.00999999977 : f32
    %cst_17 = arith.constant 1.000000e+01 : f32
    %28 = arith.maximumf %cst_16, %0 : f32
    %29 = arith.minimumf %cst_17, %28 : f32
    %cst_18 = arith.constant 1.000000e-01 : f32
    %cst_19 = arith.constant 1.000000e+01 : f32
    %30 = vector.broadcast %cst_18 : f32 to vector<1x128xf32>
    %31 = arith.maximumf %30, %7 : vector<1x128xf32>
    %32 = vector.broadcast %cst_19 : f32 to vector<1x128xf32>
    %33 = arith.minimumf %32, %31 : vector<1x128xf32>
    %34 = vector.broadcast %29 : f32 to vector<1x128xf32>
    %35 = arith.addf %34, %33 : vector<1x128xf32>
    %36 = arith.mulf %27, %35 : vector<1x128xf32>
    %37 = arith.minimumf %36, %13 : vector<1x128xf32>
    %38 = arith.subf %13, %37 : vector<1x128xf32>
    %39 = vector.broadcast %1 : f32 to vector<1x128xf32>
    %40 = arith.mulf %39, %38 : vector<1x128xf32>
    %41 = vector.broadcast %2 : f32 to vector<1x128xf32>
    %42 = arith.mulf %41, %38 : vector<1x128xf32>
    %43 = arith.mulf %42, %38 : vector<1x128xf32>
    %44 = arith.addf %40, %43 : vector<1x128xf32>
    %45 = vector.broadcast %3 : f32 to vector<1x128xf32>
    %46 = arith.addf %44, %45 : vector<1x128xf32>
    %47 = arith.addf %46, %5 : vector<1x128xf32>
    %48 = arith.addf %47, %6 : vector<1x128xf32>
    %49 = arith.negf %48 : vector<1x128xf32>
    %50 = math.exp %49 : vector<1x128xf32>
    %cst_20 = arith.constant 1.000000e+00 : f32
    %51 = vector.broadcast %cst_20 : f32 to vector<1x128xf32>
    %52 = arith.addf %51, %50 : vector<1x128xf32>
    %53 = arith.divf %51, %52 : vector<1x128xf32>
    %c0_21 = arith.constant 0 : index
    %c0_22 = arith.constant 0 : index
    %54 = vector.load %arg6[%c0_21, %c0_22] : memref<2x128xf32, #tpu.memory_space<vmem>>, vector<1x128xf32>
    tpu.vector_store %arg6[%c0_21, %c0_22], %53 {strides = array<i32>} : memref<2x128xf32, #tpu.memory_space<vmem>>, vector<1x128xf32>,
    %c1_23 = arith.constant 1 : index
    %c0_24 = arith.constant 0 : index
    %55 = vector.load %arg6[%c1_23, %c0_24] : memref<2x128xf32, #tpu.memory_space<vmem>>, vector<1x128xf32>
    tpu.vector_store %arg6[%c1_23, %c0_24], %38 {strides = array<i32>} : memref<2x128xf32, #tpu.memory_space<vmem>>, vector<1x128xf32>,
    return
  }
  func.func @transform_0(%arg0: i32) -> i32 {
    %c0_i32 = arith.constant 0 : i32
    %c0_i32_0 = arith.constant 0 : i32
    return %c0_i32 : i32
  }
  func.func @transform_1(%arg0: i32) -> (i32, i32) {
    %c0_i32 = arith.constant 0 : i32
    %c0_i32_0 = arith.constant 0 : i32
    return %c0_i32, %arg0 : i32, i32
  }
  func.func @transform_2(%arg0: i32) -> (i32, i32) {
    %c0_i32 = arith.constant 0 : i32
    %c0_i32_0 = arith.constant 0 : i32
    return %c0_i32, %arg0 : i32, i32
  }
  func.func @transform_3(%arg0: i32) -> (i32, i32) {
    %c0_i32 = arith.constant 0 : i32
    %c0_i32_0 = arith.constant 0 : i32
    return %c0_i32, %arg0 : i32, i32
  }
  func.func @transform_4(%arg0: i32) -> (i32, i32) {
    %c0_i32 = arith.constant 0 : i32
    %c0_i32_0 = arith.constant 0 : i32
    return %c0_i32, %arg0 : i32, i32
  }
  func.func @transform_5(%arg0: i32) -> (i32, i32) {
    %c0_i32 = arith.constant 0 : i32
    %c0_i32_0 = arith.constant 0 : i32
    return %c0_i32, %arg0 : i32, i32
  }
}

</mosaic_0001>

<bundles_post_ra>
// kernel: tpu_custom_call.1
= control target key start
LH: loop header
LB: loop body
LE: loop exit
PB: predicated region body
PF: predicated region fallthrough
CT: control target
= control target key end

     0   :  { %10 = vsyncpa [#allocation5], 0  ;;  %s382_s0 = inlined_call_operand.hbm [shape: f32[8], index: 0, kind: input, shape index: {}]   ;;  %s383_s1 = inlined_call_operand.hbm [shape: f32[32,128], index: 1, kind: input, shape index: {}]   ;;  %s384_s2 = inlined_call_operand.hbm [shape: f32[32,128], index: 2, kind: input, shape index: {}]   ;;  %s385_s3 = inlined_call_operand.hbm [shape: f32[8,128], index: 3, kind: input, shape index: {}]   ;;  %s386_s4 = inlined_call_operand.hbm [shape: f32[8,128], index: 4, kind: input, shape index: {}]   ;;  %s387_s5 = inlined_call_operand.hbm [shape: f32[2,128], index: 5, kind: output, shape index: {}]  }
   0x1   :  { %11 = vsyncpa [#allocation3], 0 }
   0x2   :  { %12 = vsyncpa [#allocation8], 0 }
   0x3   :  { %13 = vsyncpa [#allocation11], 0 }
   0x4   :  { %14 = vsyncpa [#allocation4], 0  ;;  %s321_s18 = smov [#allocation7]   ;;  %s322_s20 = smov [#allocation6]  }
   0x5   :  { %s40_s19 = sshll.u32 %s321_s18, 4  ;;  %s28_s21 = sshll.u32 %s322_s20, 4  ;;  %s41_s19 = int_to_ptr.vmem [resolvable:$true] %s40_s19  ;;  %s29_s21 = int_to_ptr.vmem [resolvable:$true] %s28_s21 }
   0x6   :  { %s211_s22 = scalar_lea.vmem %s41_s19, 512  ;;  %p216_p1 = scmp.lt.s32.totalorder %s41_s19, %s41_s19 }
   0x7   :  { %p212_p0 = scmp.ne.s32.totalorder %s41_s19, %s211_s22  ;;  %p217_p2 = scmp.lt.s32.totalorder %s211_s22, %s211_s22 }
   0x9   :  { %p218_p3 = por %p217_p2, %p216_p1 }
   0xb   :  { %p219_p4 = pnand %p218_p3, %p212_p0 }
   0xd   :  { %222 = shalt.err (!%p219_p4)
}
   0xe   :  { %s323_s23 = smov 128   ;;  %s324_s24 = smov 8  }
   0xf   :  { %46 = dma.hbm_to_vmem [thread:$0]  %s384_s2, 512, %s41_s19, [#allocation8], %s323_s23, %s323_s23, %s324_s24  }
  0x10   :  { %s325_s27 = smov [#allocation2]   ;;  %s239_s30 = scalar_lea.vmem %s29_s21, 512 }
  0x11   :  { %22 = dma.hbm_to_smem %s382_s0, 16, %s325_s27, [#allocation5]  }
  0x12   :  { %p240_p5 = scmp.ne.s32.totalorder %s29_s21, %s239_s30  ;;  %p244_p6 = scmp.lt.s32.totalorder %s29_s21, %s29_s21 }
  0x13   :  { %p245_p7 = scmp.lt.s32.totalorder %s239_s30, %s239_s30 }
  0x15   :  { %p246_p8 = por %p245_p7, %p244_p6 }
  0x17   :  { %p247_p9 = pnand %p246_p8, %p240_p5 }
  0x19   :  { %250 = shalt.err (!%p247_p9)
}
  0x1a   :  { %34 = dma.hbm_to_vmem [thread:$0]  %s383_s1, 512, %s29_s21, [#allocation3], %s323_s23, %s323_s23, %s324_s24  }
  0x1b   :  { %s326_s8 = smov [#allocation9]   ;;  %s327_s2 = smov [#allocation10]  }
  0x1c   :  { %s53_s9 = sshll.u32 %s326_s8, 4  ;;  %s63_s10 = sshll.u32 %s327_s2, 4  ;;  %s54_s9 = int_to_ptr.vmem [resolvable:$true] %s53_s9  ;;  %s64_s10 = int_to_ptr.vmem [resolvable:$true] %s63_s10 }
  0x1d   :  { %s259_s11 = scalar_lea.vmem %s54_s9, 128  ;;  %p264_p11 = scmp.lt.s32.totalorder %s54_s9, %s54_s9 }
  0x1e   :  { %p260_p10 = scmp.ne.s32.totalorder %s54_s9, %s259_s11  ;;  %p265_p12 = scmp.lt.s32.totalorder %s259_s11, %s259_s11 }
  0x20   :  { %p266_p13 = por %p265_p12, %p264_p11 }
  0x22   :  { %p267_p0 = pnand %p266_p13, %p260_p10 }
  0x24   :  { %270 = shalt.err (!%p267_p0)
}
  0x25   :  { %56 = dma.hbm_to_vmem [thread:$0]  %s385_s3, 128, %s54_s9, [#allocation8]  }
  0x26   :  { %s279_s13 = scalar_lea.vmem %s64_s10, 128  ;;  %p284_p2 = scmp.lt.s32.totalorder %s64_s10, %s64_s10 }
  0x27   :  { %p280_p1 = scmp.ne.s32.totalorder %s64_s10, %s279_s13  ;;  %p285_p3 = scmp.lt.s32.totalorder %s279_s13, %s279_s13 }
  0x29   :  { %p286_p4 = por %p285_p3, %p284_p2 }
  0x2b   :  { %p287_p5 = pnand %p286_p4, %p280_p1 }
  0x2d   :  { %290 = shalt.err (!%p287_p5)
}
  0x2e   :  { %66 = dma.hbm_to_vmem [thread:$0]  %s386_s4, 128, %s64_s10, [#allocation11]  }
  0x2f   :  { %311 = dma.done.wait [#allocation5], 16  }
  0x30   :  { %312 = vsyncadd [#allocation5], 4294967280 }
  0x31   :  { %313 = dma.done.wait [#allocation3], 512  }
  0x32   :  { %314 = vsyncadd [#allocation3], 4294966784 }
  0x33   :  { %315 = dma.done.wait [#allocation8], 640  }
  0x34   :  { %316 = vsyncadd [#allocation8], 4294966656 }
  0x35   :  { %317 = dma.done.wait [#allocation11], 128  }
  0x36   :  { %318 = vsyncadd [#allocation11], 4294967168 }
  0x37   :  { %82 = sfence }
  0x38   :  { %v91_v0 = vld [vmem:[#allocation7] sm:$0xff]  ;;  %v92_v1 = vld [vmem:[#allocation7 + $0x8] sm:$0xff]  ;;  %v93_v2 = vld [vmem:[#allocation7 + $0x10] sm:$0xff]  ;;  %s181_s3 = sld [smem:[#allocation2 + $0x4]]  ;;  %v328_v14 = vmov 0.0   ;;  %s330_s16 = smov 100.0  }
  0x39   :  { %v95_v3 = vld [vmem:[#allocation6] sm:$0xff]  ;;  %v96_v4 = vld [vmem:[#allocation6 + $0x8] sm:$0xff]  ;;  %v97_v5 = vld [vmem:[#allocation6 + $0x10] sm:$0xff]  ;;  %s329_s4 = smov 0.1   ;;  %s83_s18 = sld [smem:[#allocation2]] }
  0x3a   :  { %v99_v6 = vsub.f32 %v91_v0, %v95_v3  ;;  %v100_v7 = vsub.f32 %v92_v1, %v96_v4  ;;  %v116_v8 = vld [vmem:[#allocation9] sm:$0xff]  ;;  %v101_v9 = vsub.f32 %v93_v2, %v97_v5  ;;  %v94_v11 = vld [vmem:[#allocation7 + $0x18] sm:$0xff]  ;;  %v90_v28 = vld [vmem:[#allocation10 + $0x2] sm:$0x1]  ;;  %s331_s19 = smov 0.01  }
  0x3b   :  { %vm117_vm0 = vcmp.gt.f32.partialorder %v116_v8, 0.0  ;;  %v98_v12 = vld [vmem:[#allocation6 + $0x18] sm:$0xff]  ;;  %v135_v32 = vmax.f32 %v90_v28, 0.1  ;;  %s332_s21 = smov 10.0   ;;  %s178_s23 = sld [smem:[#allocation2 + $0x1]] }
  0x3c   :  { %v103_v10 = vand.u32 2147483647, %v99_v6  ;;  %v104_v13 = vand.u32 2147483647, %v100_v7  ;;  %v182_v15 = vsel %vm117_vm0, 1.0, %v328_v14  ;;  %v102_v16 = vsub.f32 %v94_v11, %v98_v12  ;;  %s179_s24 = sld [smem:[#allocation2 + $0x2]] }
  0x3d   :  { %v105_v17 = vand.u32 2147483647, %v101_v9  ;;  %v122_v19 = vmul.f32 %v182_v15, %v116_v8  ;;  %v136_v36 = vmin.f32 %v135_v32, 10.0  ;;  %s180_s25 = sld [smem:[#allocation2 + $0x3]]  ;;  %v88_v54 = vld [vmem:[#allocation10] sm:$0x1] }
  0x3e   :  { %v107_v18 = vadd.f32 %v104_v13, %v103_v10  ;;  %s120_s15 = smax.f32 %s329_s4, %s181_s3  ;;  %v106_v21 = vand.u32 2147483647, %v102_v16  ;;  %v89_v56 = vld [vmem:[#allocation10 + $0x1] sm:$0x1]  ;;  %s333_s26 = smov [#allocation12]  }
  0x3f   :  { %s121_s17 = smin.f32 %s330_s16, %s120_s15  ;;  %s133_s20 = smax.f32 %s331_s19, %s83_s18 }
  0x40   :  { %v123_v20 = vstv %s121_s17  ;;  %v108_v22 = vadd.f32 %v107_v18, %v105_v17  ;;  %s134_s22 = smin.f32 %s332_s21, %s133_s20  ;;  %s166_s27 = sshll.u32 %s333_s26, 4  ;;  %s167_s27 = int_to_ptr.vmem [resolvable:$true] %s166_s27 }
  0x41   :  { %v124_v23 = vadd.f32 %v123_v20, %v122_v19  ;;  %v137_v37 = vstv %s134_s22  ;;  %v142_v46 = vstv %s178_s23  ;;  %s291_s28 = scalar_lea.vmem %s167_s27, 32  ;;  %p296_p7 = scmp.lt.s32.totalorder %s167_s27, %s167_s27 }
  0x42   :  { %v109_v24 = vadd.f32 %v108_v22, %v106_v21  ;;  %v138_v41 = vadd.f32 %v137_v37, %v136_v36  ;;  %v144_v47 = vstv %s179_s24  ;;  %p292_p6 = scmp.ne.s32.totalorder %s167_s27, %s291_s28  ;;  %p297_p8 = scmp.lt.s32.totalorder %s291_s28, %s291_s28 }
  0x43   :  { %197 = vrsqrt.f32 %v124_v23  ;;  %v148_v52 = vstv %s180_s25 }
  0x44   :  { %v110_v25 = vrot.slane %v109_v24, 4  ;;  %p298_p9 = por %p297_p8, %p296_p7 }
  0x46   :  { %v111_v26 = vadd.f32 %v110_v25, %v109_v24  ;;  %p299_p10 = pnand %p298_p9, %p292_p6 }
  0x48   :  { %v112_v29 = vrot.slane %v111_v26, 2 }
  0x4a   :  { %v113_v33 = vadd.f32 %v112_v29, %v111_v26 }
  0x4c   :  { %v114_v38 = vrot.slane %v113_v33, 1 }
  0x4e   :  { %v115_v42 = vadd.f32 %v114_v38, %v113_v33 }
  0x50   :  { %v198_v27 = vpop.eup %197 }
  0x51   :  { %v126_v30 = vmul.f32 %v198_v27, %v182_v15 }
  0x53   :  { %v127_v31 = vrot.slane %v126_v30, 4 }
  0x55   :  { %v128_v34 = vadd.f32 %v127_v31, %v126_v30 }
  0x57   :  { %v129_v35 = vrot.slane %v128_v34, 2 }
  0x59   :  { %v130_v39 = vadd.f32 %v129_v35, %v128_v34 }
  0x5b   :  { %v131_v40 = vrot.slane %v130_v39, 1 }
  0x5d   :  { %v132_v43 = vadd.f32 %v131_v40, %v130_v39 }
  0x5f   :  { %v139_v44 = vmul.f32 %v138_v41, %v132_v43 }
  0x61   :  { %v140_v45 = vmin.f32 %v139_v44, %v115_v42 }
  0x63   :  { %v141_v48 = vsub.f32 %v115_v42, %v140_v45 }
  0x65   :  { %v143_v49 = vmul.f32 %v142_v46, %v141_v48  ;;  %v145_v50 = vmul.f32 %v144_v47, %v141_v48  ;;  %159 = vst [vmem:[#allocation12 + $0x1] sm:$0x1] %v141_v48 }
  0x67   :  { %v146_v51 = vmul.f32 %v145_v50, %v141_v48 }
  0x69   :  { %v147_v53 = vadd.f32 %v146_v51, %v143_v49 }
  0x6b   :  { %v149_v55 = vadd.f32 %v148_v52, %v147_v53 }
  0x6d   :  { %v150_v57 = vadd.f32 %v149_v55, %v88_v54 }
  0x6f   :  { %v151_v58 = vadd.f32 %v150_v57, %v89_v56 }
  0x71   :  { %v183_v59 = vmul.f32 -1.442695, %v151_v58 }
  0x73   :  { %199 = vpow2.f32 %v183_v59 }
  0x80   :  { %v200_v60 = vpop.eup %199 }
  0x81   :  { %v155_v61 = vadd.f32 1.0, %v200_v60 }
  0x83   :  { %201 = vrcp.f32 %v155_v61 }
  0x90   :  { %v202_v62 = vpop.eup %201 }
  0x91   :  { %158 = vst [vmem:[#allocation12] sm:$0x1] %v202_v62 }
  0x92   :  { %302 = shalt.err (!%p299_p10)
}
  0x93   :  { %169 = dma.vmem_to_hbm [thread:$0]  %s167_s27, 32, %s387_s5, [#allocation4]  }
  0x94   :  { %319 = dma.done.wait [#allocation4], 32  }
  0x95   :  { %320 = vsyncadd [#allocation4], 4294967264 }
  0x96   :  { %173 = vsyncpa [#allocation3], 1 }
  0x97   :  { %174 = vsyncpa [#allocation8], 1 }
  0x98   :  { %175 = vsyncpa [#allocation11], 1 }
  0x99   :  { %176 = vsyncpa [#allocation4], 1 }
  0x9a   :  { %177 = vsyncpa [#allocation5], 1 }

</bundles_post_ra>
